<compile_context>
chip_gen: v6e
topology: v6e:2x2x1
jax: 0.10.0
libtpu: 0.0.40
codegen_flags: <defaults>
</compile_context>

<pallas_src>
import functools

import jax
import jax.numpy as jnp
from jax.experimental import pallas as pl
from jax.experimental.pallas import tpu as pltpu

LANE = 128


def _round_up(x, m):
    return (x + m - 1) // m * m


def _tensorcores_per_chip():
    """Best-effort TensorCore count per chip (2 on v7x, 1 on v5e/v6e)."""
    try:
        return max(1, int(getattr(jax.devices()[0], "num_cores", 1) or 1))
    except Exception:
        return 1


def _default_tile_b(B):
    """One grid step per TensorCore (grid=1 on v5e/v6e, grid=2 on v7x),
    capped so very large batches still tile cleanly within VMEM."""
    per_core = -(-B // _tensorcores_per_chip())
    return min(_round_up(per_core, 8), 2048)


def actor_kernel(x_ref, w1_ref, b1_ref, w2_ref, b2_ref, out_ref):
    """One batch tile of the forward pass; all weights resident in VMEM.

    x_ref  : (TB, S)  f32
    w1_ref : (S, H)   bf16      b1_ref : (1, H)   f32
    w2_ref : (H, Ap)  bf16      b2_ref : (1, Ap)  f32   (Ap = lane-padded A)
    out_ref: (TB, Ap) f32
    """
    # fc1 + ReLU : bf16 MXU operands, f32 accumulation, f32 epilogue on VPU.
    x = x_ref[...].astype(jnp.bfloat16)
    h = jnp.dot(x, w1_ref[...], preferred_element_type=jnp.float32) + b1_ref[...]
    h = jnp.maximum(h, 0.0)
    # fc2 + tanh (tanh -> EUP). Padded output lanes compute tanh(0) = 0.
    y = jnp.dot(h.astype(jnp.bfloat16), w2_ref[...],
                preferred_element_type=jnp.float32) + b2_ref[...]
    out_ref[...] = jnp.tanh(y).astype(out_ref.dtype)


def prepare_actor_params(w1, b1, w2, b2):
    """One-time param prep: cast matmul weights to bf16 and pad the output
    (action) dimension of fc2 up to a full 128-lane width."""
    H, A = w2.shape
    Ap = _round_up(A, LANE)
    w2p = jnp.zeros((H, Ap), jnp.float32).at[:, :A].set(w2)
    b2p = jnp.zeros((1, Ap), jnp.float32).at[:, :A].set(b2.reshape(1, A))
    return (w1.astype(jnp.bfloat16),
            b1.astype(jnp.float32).reshape(1, -1),
            w2p.astype(jnp.bfloat16),
            b2p.astype(jnp.float32))


@functools.partial(jax.jit, static_argnames=("action_size", "tile_b"))
def actor_forward(state, w1, b1, w2p, b2p, *, action_size, tile_b=None):
    """Pallas forward. `w1/b1/w2p/b2p` must come from prepare_actor_params."""
    B, S = state.shape
    H = w1.shape[1]
    Ap = w2p.shape[1]

    if tile_b is None:
        tile_b = _default_tile_b(B)
    # Batch tile: multiple of 8 sublanes, no bigger than the padded batch.
    tb = _round_up(max(8, min(tile_b, _round_up(B, 8))), 8)
    Bp = _round_up(B, tb)
    if Bp != B:
        state = jnp.pad(state, ((0, Bp - B), (0, 0)))

    out = pl.pallas_call(
        actor_kernel,
        out_shape=jax.ShapeDtypeStruct((Bp, Ap), jnp.float32),
        grid=(Bp // tb,),
        in_specs=[
            pl.BlockSpec((tb, S), lambda i: (i, 0)),   # batch-tiled input
            pl.BlockSpec((S, H), lambda i: (0, 0)),    # weights stay resident
            pl.BlockSpec((1, H), lambda i: (0, 0)),
            pl.BlockSpec((H, Ap), lambda i: (0, 0)),
            pl.BlockSpec((1, Ap), lambda i: (0, 0)),
        ],
        out_specs=pl.BlockSpec((tb, Ap), lambda i: (i, 0)),   # lane-dense store
        compiler_params=pltpu.CompilerParams(
            dimension_semantics=("parallel",),  # shard batch across TCs on v7x
        ),
    )(state, w1, b1, w2p, b2p)

    # Padded batch rows hold tanh(b2) and padded action lanes hold tanh(0)=0;
    # both are sliced off here -- do not remove this slice.
    return out[:B, :action_size]


def init_actor_params(key, state_size, action_size, fc_units):
    """Deterministic init mirroring Actor.reset_parameters().

    hidden_init uses weight.size()[0] == out_features (fc_units) as fan_in,
    faithfully reproduced. fc2 weights ~ U(0, 3e-3), also faithful to the
    PyTorch source. Biases keep PyTorch's default Linear bias init
    U(-1/sqrt(in_features), 1/sqrt(in_features)).
    """
    k1, k2, k3, k4 = jax.random.split(key, 4)
    lim1 = 1.0 / jnp.sqrt(jnp.float32(fc_units))
    w1 = jax.random.uniform(k1, (state_size, fc_units), jnp.float32, -lim1, lim1)
    b1_lim = 1.0 / jnp.sqrt(jnp.float32(state_size))
    b1 = jax.random.uniform(k3, (1, fc_units), jnp.float32, -b1_lim, b1_lim)
    w2 = jax.random.uniform(k2, (fc_units, action_size), jnp.float32, 0.0, 0.003)
    b2_lim = 1.0 / jnp.sqrt(jnp.float32(fc_units))
    b2 = jax.random.uniform(k4, (1, action_size), jnp.float32, -b2_lim, b2_lim)
    return w1, b1, w2, b2


def actor_reference_bf16(state, w1, b1, w2, b2):
    """Same math as the kernel (bf16 matmul operands, f32 accumulation)."""
    h = jnp.dot(state.astype(jnp.bfloat16), w1.astype(jnp.bfloat16),
                preferred_element_type=jnp.float32) + b1
    h = jnp.maximum(h, 0.0)
    y = jnp.dot(h.astype(jnp.bfloat16), w2.astype(jnp.bfloat16),
                preferred_element_type=jnp.float32) + b2
    return jnp.tanh(y)


def actor_reference_f32(state, w1, b1, w2, b2):
    h = jnp.maximum(state @ w1 + b1, 0.0)
    return jnp.tanh(h @ w2 + b2)


if __name__ == "__main__":
    batch = 256            # RL-style replay batch
    state_size = 32
    action_size = 4
    fc_units = 256         # module default; lane-dense hidden dim

    key = jax.random.PRNGKey(0)
    kx, kp = jax.random.split(key)
    state = jax.random.normal(kx, (batch, state_size), jnp.float32)
    w1, b1, w2, b2 = init_actor_params(kp, state_size, action_size, fc_units)

    # One-time prep: bf16 weights + lane-padded fc2.
    w1p, b1p, w2p, b2p = prepare_actor_params(w1, b1, w2, b2)

    out = actor_forward(state, w1p, b1p, w2p, b2p, action_size=action_size)
    out = jax.block_until_ready(out)

    assert out.shape == (batch, action_size)
    # Tight check against the same bf16-operand / f32-accum math.
    ref_bf16 = actor_reference_bf16(state, w1, b1, w2, b2)
    assert jnp.allclose(out, ref_bf16, atol=1e-4, rtol=1e-4)
    # Loose check against the pure-f32 PyTorch-equivalent forward
    # (bf16 operand rounding, tanh near-linear for small pre-activations).
    ref_f32 = actor_reference_f32(state, w1, b1, w2, b2)
    assert jnp.allclose(out, ref_f32, atol=2e-2, rtol=2e-2)

    print("KERNEL_OK")
</pallas_src>

<mosaic_0001>
module attributes {stable_mosaic.version = 11 : i64} {
  func.func @actor_kernel(%arg0: i32, %arg1: memref<256x32xf32, #tpu.memory_space<vmem>>, %arg2: memref<32x256xbf16, #tpu.memory_space<vmem>>, %arg3: memref<1x256xf32, #tpu.memory_space<vmem>>, %arg4: memref<256x128xbf16, #tpu.memory_space<vmem>>, %arg5: memref<1x128xf32, #tpu.memory_space<vmem>>, %arg6: memref<256x128xf32, #tpu.memory_space<vmem>>) attributes {dimension_semantics = [#tpu.dimension_semantics<parallel>], iteration_bounds = array<i64: 1>, scalar_prefetch = 0 : i64, scratch_operands = 0 : i64, tpu.core_type = #tpu.core_type<tc>, window_params = [{transform_indices = @transform_0, window_bounds = array<i64: 256, 32>}, {pipeline_mode = #tpu.pipeline_mode<synchronous>, transform_indices = @transform_1, window_bounds = array<i64: 32, 256>}, {pipeline_mode = #tpu.pipeline_mode<synchronous>, transform_indices = @transform_2, window_bounds = array<i64: 1, 256>}, {pipeline_mode = #tpu.pipeline_mode<synchronous>, transform_indices = @transform_3, window_bounds = array<i64: 256, 128>}, {pipeline_mode = #tpu.pipeline_mode<synchronous>, transform_indices = @transform_4, window_bounds = array<i64: 1, 128>}, {transform_indices = @transform_5, window_bounds = array<i64: 256, 128>}]} {
    %c0 = arith.constant 0 : index
    %c0_0 = arith.constant 0 : index
    %0 = vector.load %arg1[%c0, %c0_0] : memref<256x32xf32, #tpu.memory_space<vmem>>, vector<256x32xf32>
    %1 = arith.truncf %0 : vector<256x32xf32> to vector<256x32xbf16>
    %c0_1 = arith.constant 0 : index
    %c0_2 = arith.constant 0 : index
    %2 = vector.load %arg2[%c0_1, %c0_2] : memref<32x256xbf16, #tpu.memory_space<vmem>>, vector<32x256xbf16>
    %cst = arith.constant dense<0.000000e+00> : vector<256x256xf32>
    %3 = tpu.matmul %1, %2, %cst {dimension_numbers = #tpu.dot_dimension_numbers<[1], [0], [0], [1], [0, 0, 1, 1], [], []>} : vector<256x32xbf16>, vector<32x256xbf16>, vector<256x256xf32> -> vector<256x256xf32>
    %c0_3 = arith.constant 0 : index
    %c0_4 = arith.constant 0 : index
    %4 = vector.load %arg3[%c0_3, %c0_4] : memref<1x256xf32, #tpu.memory_space<vmem>>, vector<1x256xf32>
    %5 = vector.broadcast %4 : vector<1x256xf32> to vector<256x256xf32>
    %6 = arith.addf %3, %5 : vector<256x256xf32>
    %cst_5 = arith.constant 0.000000e+00 : f32
    %7 = vector.broadcast %cst_5 : f32 to vector<256x256xf32>
    %8 = arith.maximumf %6, %7 : vector<256x256xf32>
    %9 = arith.truncf %8 : vector<256x256xf32> to vector<256x256xbf16>
    %c0_6 = arith.constant 0 : index
    %c0_7 = arith.constant 0 : index
    %10 = vector.load %arg4[%c0_6, %c0_7] : memref<256x128xbf16, #tpu.memory_space<vmem>>, vector<256x128xbf16>
    %cst_8 = arith.constant dense<0.000000e+00> : vector<256x128xf32>
    %11 = tpu.matmul %9, %10, %cst_8 {dimension_numbers = #tpu.dot_dimension_numbers<[1], [0], [0], [1], [0, 0, 1, 1], [], []>} : vector<256x256xbf16>, vector<256x128xbf16>, vector<256x128xf32> -> vector<256x128xf32>
    %c0_9 = arith.constant 0 : index
    %c0_10 = arith.constant 0 : index
    %12 = vector.load %arg5[%c0_9, %c0_10] : memref<1x128xf32, #tpu.memory_space<vmem>>, vector<1x128xf32>
    %13 = vector.broadcast %12 : vector<1x128xf32> to vector<256x128xf32>
    %14 = arith.addf %11, %13 : vector<256x128xf32>
    %15 = math.tanh %14 : vector<256x128xf32>
    %c0_11 = arith.constant 0 : index
    %c0_12 = arith.constant 0 : index
    %16 = vector.load %arg6[%c0_11, %c0_12] : memref<256x128xf32, #tpu.memory_space<vmem>>, vector<256x128xf32>
    tpu.vector_store %arg6[%c0_11, %c0_12], %15 {strides = array<i32>} : memref<256x128xf32, #tpu.memory_space<vmem>>, vector<256x128xf32>,
    return
  }
  func.func @transform_0(%arg0: i32) -> (i32, i32) {
    %c0_i32 = arith.constant 0 : i32
    %c0_i32_0 = arith.constant 0 : i32
    return %arg0, %c0_i32 : i32, i32
  }
  func.func @transform_1(%arg0: i32) -> (i32, i32) {
    %c0_i32 = arith.constant 0 : i32
    %c0_i32_0 = arith.constant 0 : i32
    %c0_i32_1 = arith.constant 0 : i32
    return %c0_i32, %c0_i32_0 : i32, i32
  }
  func.func @transform_2(%arg0: i32) -> (i32, i32) {
    %c0_i32 = arith.constant 0 : i32
    %c0_i32_0 = arith.constant 0 : i32
    %c0_i32_1 = arith.constant 0 : i32
    return %c0_i32, %c0_i32_0 : i32, i32
  }
  func.func @transform_3(%arg0: i32) -> (i32, i32) {
    %c0_i32 = arith.constant 0 : i32
    %c0_i32_0 = arith.constant 0 : i32
    %c0_i32_1 = arith.constant 0 : i32
    return %c0_i32, %c0_i32_0 : i32, i32
  }
  func.func @transform_4(%arg0: i32) -> (i32, i32) {
    %c0_i32 = arith.constant 0 : i32
    %c0_i32_0 = arith.constant 0 : i32
    %c0_i32_1 = arith.constant 0 : i32
    return %c0_i32, %c0_i32_0 : i32, i32
  }
  func.func @transform_5(%arg0: i32) -> (i32, i32) {
    %c0_i32 = arith.constant 0 : i32
    %c0_i32_0 = arith.constant 0 : i32
    return %arg0, %c0_i32 : i32, i32
  }
}

</mosaic_0001>

<bundles_post_ra>
// kernel: actor_forward.1
= control target key start
LH: loop header
LB: loop body
LE: loop exit
PB: predicated region body
PF: predicated region fallthrough
CT: control target
= control target key end

     0   :  { %v1059_v1 = vmov 0   ;;  %vm105_vm0 = vcmask 261120   ;;  %s1482_s1 = inlined_call_operand.vmem [shape: bf16[32,256], index: 1, kind: input, shape index: {}]   ;;  %s1483_s0 = inlined_call_operand.vmem [shape: f32[256,32], index: 0, kind: input, shape index: {}]   ;;  %s1484_s3 = inlined_call_operand.vmem [shape: bf16[256,128], index: 3, kind: input, shape index: {}]   ;;  %s1485_s2 = inlined_call_operand.vmem [shape: f32[1,256], index: 2, kind: input, shape index: {}]   ;;  %s1486_s4 = inlined_call_operand.vmem [shape: f32[1,128], index: 4, kind: input, shape index: {}]   ;;  %s1487_s5 = inlined_call_operand.vmem [shape: f32[256,128], index: 5, kind: output, shape index: {}]  }
   0x1   :  { %v973_v0 = vld [vmem:[%s1482_s1 + $0x14] ss:$8 sps:$4 sm:$0xff]   ;;  %186 = vmatprep.mubr.bf16.mxu0 %v1059_v1  ;;  %v975_v2 = vld [vmem:[%s1482_s1 + $0x10] ss:$8 sps:$4 sm:$0xff]   ;;  %v976_v3 = vld [vmem:[%s1482_s1 + $0x4] ss:$8 sps:$4 sm:$0xff]  }
   0x2   :  { %166 = vmatprep.subr.bf16.mxu0 %v973_v0  ;;  %v978_v4 = vld [vmem:[%s1482_s1] ss:$8 sps:$4 sm:$0xff]   ;;  %v23_v8 = vld [vmem:[%s1483_s0 + $0x10] sm:$0xff]  ;;  %v24_v9 = vld [vmem:[%s1483_s0 + $0x18] sm:$0xff] }
   0x3   :  { %167 = vmatpush1.bf16.msra.mxu0 %v975_v2  ;;  %v21_v5 = vld [vmem:[%s1483_s0] sm:$0xff]  ;;  %v22_v6 = vld [vmem:[%s1483_s0 + $0x8] sm:$0xff]  ;;  %v54_v10 = vpack.c.bf16 %v24_v9, %v23_v8  ;;  %v979_v11 = vld [vmem:[%s1484_s3 + $0x78] sm:$0xff]  }
   0x4   :  { %168 = vmatprep.subr.bf16.mxu0 %v976_v3  ;;  %v53_v7 = vpack.c.bf16 %v22_v6, %v21_v5  ;;  %v980_v12 = vld [vmem:[%s1484_s3 + $0x38] sm:$0xff]   ;;  %v981_v13 = vld [vmem:[%s1484_s3 + $0x70] sm:$0xff]   ;;  %956 = vmatprep.subr.bf16.mxu1 %v979_v11  ;;  %v25_v14 = vld [vmem:[%s1483_s0 + $0x20] sm:$0xff]  ;;  %v75_v6 = vlaneseq }
   0x5   :  { %v982_v15 = vld [vmem:[%s1484_s3 + $0x30] sm:$0xff]   ;;  %964 = vmatpush3.bf16.msra.mxu1 %v980_v12  ;;  %v983_v16 = vld [vmem:[%s1484_s3 + $0x68] sm:$0xff]   ;;  %v985_v20 = vld [vmem:[%s1484_s3 + $0x60] sm:$0xff]  }
   0x6   :  { %v26_v17 = vld [vmem:[%s1483_s0 + $0x28] sm:$0xff]  ;;  %957 = vmatprep.subr.bf16.mxu1 %v981_v13  ;;  %v986_v21 = vld [vmem:[%s1484_s3 + $0x20] sm:$0xff]   ;;  %v987_v22 = vld [vmem:[%s1484_s3 + $0x58] sm:$0xff]  }
   0x7   :  { %169 = vmatpush1.bf16.msra.mxu0 %v978_v4  ;;  %v984_v18 = vld [vmem:[%s1484_s3 + $0x28] sm:$0xff]   ;;  %v55_v19 = vpack.c.bf16 %v26_v17, %v25_v14  ;;  %v27_v23 = vld [vmem:[%s1483_s0 + $0x30] sm:$0xff]  ;;  %v28_v24 = vld [vmem:[%s1483_s0 + $0x38] sm:$0xff] }
   0x8   :  { %844 = vmatprep.subr.bf16.mxu0 %v979_v11  ;;  %v988_v25 = vld [vmem:[%s1484_s3 + $0x18] sm:$0xff]   ;;  %v56_v26 = vpack.c.bf16 %v28_v24, %v27_v23  ;;  %v29_v27 = vld [vmem:[%s1483_s0 + $0x40] sm:$0xff]  ;;  %v30_v28 = vld [vmem:[%s1483_s0 + $0x48] sm:$0xff] }
   0x9   :  { %965 = vmatpush3.bf16.msra.mxu1 %v982_v15  ;;  %v57_v29 = vpack.c.bf16 %v30_v28, %v29_v27  ;;  %v31_v30 = vld [vmem:[%s1483_s0 + $0x50] sm:$0xff]  ;;  %v32_v31 = vld [vmem:[%s1483_s0 + $0x58] sm:$0xff]  ;;  %v33_v33 = vld [vmem:[%s1483_s0 + $0x60] sm:$0xff] }
   0xa   :  { %811 = vmatmul.mubr.msk.bf16.vlgmr.msra.gmra.mxu0 %vm105_vm0, %v53_v7  ;;  %958 = vmatprep.subr.bf16.mxu1 %v983_v16  ;;  %v58_v32 = vpack.c.bf16 %v32_v31, %v31_v30  ;;  %v34_v34 = vld [vmem:[%s1483_s0 + $0x68] sm:$0xff]  ;;  %v35_v36 = vld [vmem:[%s1483_s0 + $0x70] sm:$0xff]  ;;  %v36_v37 = vld [vmem:[%s1483_s0 + $0x78] sm:$0xff]  ;;  %v76_v7 = vshrl.u32 %v75_v6, 7 }
   0xb   :  { %196 = vmatprep.mubr.bf16.mxu0 %v1059_v1  ;;  %845 = vmatpush3.bf16.msra.mxu0 %v980_v12  ;;  %v59_v35 = vpack.c.bf16 %v34_v34, %v33_v33  ;;  %v60_v38 = vpack.c.bf16 %v36_v37, %v35_v36  ;;  %v37_v39 = vld [vmem:[%s1483_s0 + $0x80] sm:$0xff]  ;;  %v38_v40 = vld [vmem:[%s1483_s0 + $0x88] sm:$0xff]  ;;  %v989_v42 = vld [vmem:[%s1484_s3 + $0x50] sm:$0xff]  }
   0xc   :  { %846 = vmatprep.subr.bf16.mxu0 %v981_v13  ;;  %v61_v41 = vpack.c.bf16 %v38_v40, %v37_v39  ;;  %v39_v43 = vld [vmem:[%s1483_s0 + $0x90] sm:$0xff]  ;;  %v40_v44 = vld [vmem:[%s1483_s0 + $0x98] sm:$0xff]  ;;  %v991_v47 = vld [vmem:[%s1484_s3 + $0x48] sm:$0xff]   ;;  %v81_v8 = vsub.s32 1, %v76_v7  ;;  %v77_v9 = vsub.s32 0, %v76_v7 }
   0xd   :  { %966 = vmatpush3.bf16.msra.mxu1 %v984_v18  ;;  %v990_v45 = vld [vmem:[%s1484_s3 + $0x10] sm:$0xff]   ;;  %v62_v46 = vpack.c.bf16 %v40_v44, %v39_v43  ;;  %v992_v48 = vld [vmem:[%s1484_s3 + $0x8] sm:$0xff]   ;;  %v993_v49 = vld [vmem:[%s1484_s3 + $0x40] sm:$0xff]  }
   0xe   :  { %959 = vmatprep.subr.bf16.mxu1 %v985_v20  ;;  %v41_v50 = vld [vmem:[%s1483_s0 + $0xa0] sm:$0xff]  ;;  %v42_v51 = vld [vmem:[%s1483_s0 + $0xa8] sm:$0xff]  ;;  %v43_v54 = vld [vmem:[%s1483_s0 + $0xb0] sm:$0xff] }
   0xf   :  { %847 = vmatpush3.bf16.msra.mxu0 %v982_v15  ;;  %v994_v52 = vld [vmem:[%s1484_s3] sm:$0xff]   ;;  %v63_v53 = vpack.c.bf16 %v42_v51, %v41_v50  ;;  %v44_v55 = vld [vmem:[%s1483_s0 + $0xb8] sm:$0xff]  ;;  %v46_v58 = vld [vmem:[%s1483_s0 + $0xc8] sm:$0xff] }
  0x10   :  { %848 = vmatprep.subr.bf16.mxu0 %v983_v16  ;;  %v64_v56 = vpack.c.bf16 %v44_v55, %v43_v54  ;;  %v45_v57 = vld [vmem:[%s1483_s0 + $0xc0] sm:$0xff]  ;;  %v47_v60 = vld [vmem:[%s1483_s0 + $0xd0] sm:$0xff]  ;;  %v48_v61 = vld [vmem:[%s1483_s0 + $0xd8] sm:$0xff] }
  0x11   :  { %967 = vmatpush3.bf16.msra.mxu1 %v986_v21  ;;  %v65_v59 = vpack.c.bf16 %v46_v58, %v45_v57  ;;  %v66_v62 = vpack.c.bf16 %v48_v61, %v47_v60  ;;  %v49_v63 = vld [vmem:[%s1483_s0 + $0xe0] sm:$0xff]  ;;  %v50_v0 = vld [vmem:[%s1483_s0 + $0xe8] sm:$0xff]  ;;  %v51_v3 = vld [vmem:[%s1483_s0 + $0xf0] sm:$0xff] }
  0x12   :  { %812 = vmatmul.mubr.msk.bf16.gmra.mxu0 %vm105_vm0, %v54_v10  ;;  %960 = vmatprep.subr.bf16.mxu1 %v987_v22  ;;  %v67_v2 = vpack.c.bf16 %v50_v0, %v49_v63  ;;  %v52_v4 = vld [vmem:[%s1483_s0 + $0xf8] sm:$0xff]  ;;  %v73_v10 = vld [vmem:[%s1485_s2] sm:$0x3] }
  0x13   :  { %206 = vmatprep.mubr.bf16.mxu0 %v1059_v1  ;;  %849 = vmatpush3.bf16.msra.mxu0 %v984_v18  ;;  %v68_v5 = vpack.c.bf16 %v52_v4, %v51_v3  ;;  %v1281_v11 = vrot.slane %v73_v10, %v81_v8  ;;  %v1283_v12 = vrot.slane %v73_v10, %v77_v9 }
  0x14   :  { %850 = vmatprep.subr.bf16.mxu0 %v985_v20 }
  0x15   :  { %968 = vmatpush3.bf16.msra.mxu1 %v988_v25 }
  0x16   :  { %961 = vmatprep.subr.bf16.mxu1 %v989_v42 }
  0x17   :  { %851 = vmatpush3.bf16.msra.mxu0 %v986_v21 }
  0x18   :  { %852 = vmatprep.subr.bf16.mxu0 %v987_v22 }
  0x19   :  { %969 = vmatpush3.bf16.msra.mxu1 %v990_v45 }
  0x1a   :  { %813 = vmatmul.mubr.msk.bf16.gmra.mxu0 %vm105_vm0, %v55_v19  ;;  %962 = vmatprep.subr.bf16.mxu1 %v991_v47 }
  0x1b   :  { %216 = vmatprep.mubr.bf16.mxu0 %v1059_v1  ;;  %853 = vmatpush3.bf16.msra.mxu0 %v988_v25 }
  0x1c   :  { %854 = vmatprep.subr.bf16.mxu0 %v989_v42 }
  0x1d   :  { %970 = vmatpush3.bf16.msra.mxu1 %v992_v48 }
  0x1e   :  { %963 = vmatprep.subr.bf16.mxu1 %v993_v49 }
  0x1f   :  { %855 = vmatpush3.bf16.msra.mxu0 %v990_v45 }
  0x20   :  { %856 = vmatprep.subr.bf16.mxu0 %v991_v47 }
  0x21   :  { %971 = vmatpush3.bf16.msra.mxu1 %v994_v52 }
  0x22   :  { %814 = vmatmul.mubr.msk.bf16.gmra.mxu0 %vm105_vm0, %v56_v26 }
  0x23   :  { %226 = vmatprep.mubr.bf16.mxu0 %v1059_v1  ;;  %857 = vmatpush3.bf16.msra.mxu0 %v992_v48 }
  0x24   :  { %858 = vmatprep.subr.bf16.mxu0 %v993_v49 }
  0x27   :  { %859 = vmatpush3.bf16.msra.mxu0 %v994_v52 }
  0x2a   :  { %815 = vmatmul.mubr.msk.bf16.gmra.mxu0 %vm105_vm0, %v57_v29 }
  0x2b   :  { %236 = vmatprep.mubr.bf16.mxu0 %v1059_v1 }
  0x32   :  { %816 = vmatmul.mubr.msk.bf16.gmra.mxu0 %vm105_vm0, %v58_v32 }
  0x33   :  { %246 = vmatprep.mubr.bf16.mxu0 %v1059_v1 }
  0x3a   :  { %817 = vmatmul.mubr.msk.bf16.gmra.mxu0 %vm105_vm0, %v59_v35 }
  0x3b   :  { %256 = vmatprep.mubr.bf16.mxu0 %v1059_v1 }
  0x42   :  { %818 = vmatmul.mubr.msk.bf16.gmra.mxu0 %vm105_vm0, %v60_v38 }
  0x43   :  { %266 = vmatprep.mubr.bf16.mxu0 %v1059_v1 }
  0x4a   :  { %819 = vmatmul.mubr.msk.bf16.gmra.mxu0 %vm105_vm0, %v61_v41 }
  0x4b   :  { %276 = vmatprep.mubr.bf16.mxu0 %v1059_v1 }
  0x52   :  { %820 = vmatmul.mubr.msk.bf16.gmra.mxu0 %vm105_vm0, %v62_v46 }
  0x53   :  { %286 = vmatprep.mubr.bf16.mxu0 %v1059_v1 }
  0x5a   :  { %821 = vmatmul.mubr.msk.bf16.gmra.mxu0 %vm105_vm0, %v63_v53 }
  0x5b   :  { %296 = vmatprep.mubr.bf16.mxu0 %v1059_v1 }
  0x62   :  { %822 = vmatmul.mubr.msk.bf16.gmra.mxu0 %vm105_vm0, %v64_v56 }
  0x63   :  { %306 = vmatprep.mubr.bf16.mxu0 %v1059_v1 }
  0x6a   :  { %823 = vmatmul.mubr.msk.bf16.gmra.mxu0 %vm105_vm0, %v65_v59 }
  0x6b   :  { %316 = vmatprep.mubr.bf16.mxu0 %v1059_v1 }
  0x72   :  { %824 = vmatmul.mubr.msk.bf16.gmra.mxu0 %vm105_vm0, %v66_v62 }
  0x73   :  { %326 = vmatprep.mubr.bf16.mxu0 %v1059_v1 }
  0x7a   :  { %825 = vmatmul.mubr.msk.bf16.gmra.mxu0 %vm105_vm0, %v67_v2 }
  0x7b   :  { %336 = vmatprep.mubr.bf16.mxu0 %v1059_v1 }
  0x82   :  { %826 = vmatmul.mubr.msk.bf16.gmra.mxu0 %vm105_vm0, %v68_v5 }
  0xca   :  { %v188_v1 = vpop.f32.mrf.mxu0 }
  0xcb   :  { %v189_v17 = vadd.f32 %v188_v1, %v1283_v12 }
  0xcc   :  { %v190_v13 = vpop.f32.mrf.mxu0 }
  0xcd   :  { %v191_v15 = vadd.f32 %v190_v13, %v1281_v11  ;;  %v347_v24 = vmax.f32 %v189_v17, 0.0 }
  0xce   :  { %v192_v14 = vpop.f32.mrf.mxu0 }
  0xcf   :  { %v193_v16 = vadd.f32 %v192_v14, %v1283_v12  ;;  %v348_v22 = vmax.f32 %v191_v15, 0.0 }
  0xd0   :  { %v194_v18 = vpop.f32.mrf.mxu0 }
  0xd1   :  { %v195_v19 = vadd.f32 %v194_v18, %v1281_v11  ;;  %v349_v20 = vmax.f32 %v193_v16, 0.0 }
  0xd2   :  { %v198_v21 = vpop.f32.mrf.mxu0 }
  0xd3   :  { %v350_v23 = vmax.f32 %v195_v19, 0.0  ;;  %v411_v27 = vpack.c.bf16 %v349_v20, %v347_v24  ;;  %v199_v31 = vadd.f32 %v198_v21, %v1283_v12 }
  0xd4   :  { %v200_v25 = vpop.f32.mrf.mxu0 }
  0xd5   :  { %v412_v26 = vpack.c.bf16 %v350_v23, %v348_v22  ;;  %v201_v29 = vadd.f32 %v200_v25, %v1281_v11  ;;  %v351_v38 = vmax.f32 %v199_v31, 0.0 }
  0xd6   :  { %v202_v28 = vpop.f32.mrf.mxu0 }
  0xd7   :  { %v203_v30 = vadd.f32 %v202_v28, %v1283_v12  ;;  %610 = vmatprep.mubr.bf16.mxu0 %v412_v26  ;;  %v352_v36 = vmax.f32 %v201_v29, 0.0 }
  0xd8   :  { %v204_v32 = vpop.f32.mrf.mxu0  ;;  %611 = vmatmul.mubr.bf16.vlgmr.msra.gmra.mxu0 %v411_v27 }
  0xd9   :  { %v205_v33 = vadd.f32 %v204_v32, %v1281_v11  ;;  %v353_v34 = vmax.f32 %v203_v30, 0.0 }
  0xda   :  { %v208_v35 = vpop.f32.mrf.mxu0 }
  0xdb   :  { %v354_v37 = vmax.f32 %v205_v33, 0.0  ;;  %v413_v41 = vpack.c.bf16 %v353_v34, %v351_v38  ;;  %v209_v45 = vadd.f32 %v208_v35, %v1283_v12 }
  0xdc   :  { %v210_v39 = vpop.f32.mrf.mxu0 }
  0xdd   :  { %v414_v40 = vpack.c.bf16 %v354_v37, %v352_v36  ;;  %v211_v43 = vadd.f32 %v210_v39, %v1281_v11  ;;  %v355_v52 = vmax.f32 %v209_v45, 0.0 }
  0xde   :  { %v212_v42 = vpop.f32.mrf.mxu0 }
  0xdf   :  { %v213_v44 = vadd.f32 %v212_v42, %v1283_v12  ;;  %618 = vmatprep.mubr.bf16.mxu1 %v414_v40  ;;  %v356_v50 = vmax.f32 %v211_v43, 0.0 }
  0xe0   :  { %v214_v46 = vpop.f32.mrf.mxu0  ;;  %619 = vmatmul.mubr.bf16.vlgmr.msra.gmra.mxu1 %v413_v41 }
  0xe1   :  { %v215_v47 = vadd.f32 %v214_v46, %v1281_v11  ;;  %v357_v48 = vmax.f32 %v213_v44, 0.0 }
  0xe2   :  { %v218_v49 = vpop.f32.mrf.mxu0 }
  0xe3   :  { %v358_v51 = vmax.f32 %v215_v47, 0.0  ;;  %v415_v55 = vpack.c.bf16 %v357_v48, %v355_v52  ;;  %v219_v59 = vadd.f32 %v218_v49, %v1283_v12 }
  0xe4   :  { %v220_v53 = vpop.f32.mrf.mxu0 }
  0xe5   :  { %v416_v54 = vpack.c.bf16 %v358_v51, %v356_v50  ;;  %v221_v57 = vadd.f32 %v220_v53, %v1281_v11  ;;  %v359_v3 = vmax.f32 %v219_v59, 0.0 }
  0xe6   :  { %v222_v56 = vpop.f32.mrf.mxu0 }
  0xe7   :  { %v223_v58 = vadd.f32 %v222_v56, %v1283_v12  ;;  %626 = vmatprep.mubr.bf16.mxu1 %v416_v54  ;;  %v360_v0 = vmax.f32 %v221_v57, 0.0 }
  0xe8   :  { %v224_v60 = vpop.f32.mrf.mxu0  ;;  %627 = vmatmul.mubr.bf16.gmra.mxu1 %v415_v55 }
  0xe9   :  { %v225_v61 = vadd.f32 %v224_v60, %v1281_v11  ;;  %v361_v62 = vmax.f32 %v223_v58, 0.0 }
  0xea   :  { %v228_v63 = vpop.f32.mrf.mxu0 }
  0xeb   :  { %v362_v2 = vmax.f32 %v225_v61, 0.0  ;;  %v417_v6 = vpack.c.bf16 %v361_v62, %v359_v3  ;;  %v229_v10 = vadd.f32 %v228_v63, %v1283_v12 }
  0xec   :  { %v230_v4 = vpop.f32.mrf.mxu0 }
  0xed   :  { %v418_v5 = vpack.c.bf16 %v362_v2, %v360_v0  ;;  %v231_v8 = vadd.f32 %v230_v4, %v1281_v11  ;;  %v363_v18 = vmax.f32 %v229_v10, 0.0 }
  0xee   :  { %v232_v7 = vpop.f32.mrf.mxu0 }
  0xef   :  { %v233_v9 = vadd.f32 %v232_v7, %v1283_v12  ;;  %634 = vmatprep.mubr.bf16.mxu1 %v418_v5  ;;  %v364_v16 = vmax.f32 %v231_v8, 0.0 }
  0xf0   :  { %v234_v1 = vpop.f32.mrf.mxu0  ;;  %635 = vmatmul.mubr.bf16.gmra.mxu1 %v417_v6 }
  0xf1   :  { %v235_v13 = vadd.f32 %v234_v1, %v1281_v11  ;;  %v365_v14 = vmax.f32 %v233_v9, 0.0 }
  0xf2   :  { %v238_v15 = vpop.f32.mrf.mxu0 }
  0xf3   :  { %v366_v17 = vmax.f32 %v235_v13, 0.0  ;;  %v419_v21 = vpack.c.bf16 %v365_v14, %v363_v18  ;;  %v239_v25 = vadd.f32 %v238_v15, %v1283_v12 }
  0xf4   :  { %v240_v19 = vpop.f32.mrf.mxu0 }
  0xf5   :  { %v420_v20 = vpack.c.bf16 %v366_v17, %v364_v16  ;;  %v241_v23 = vadd.f32 %v240_v19, %v1281_v11  ;;  %v367_v32 = vmax.f32 %v239_v25, 0.0 }
  0xf6   :  { %v242_v22 = vpop.f32.mrf.mxu0 }
  0xf7   :  { %v243_v24 = vadd.f32 %v242_v22, %v1283_v12  ;;  %642 = vmatprep.mubr.bf16.mxu1 %v420_v20  ;;  %v368_v30 = vmax.f32 %v241_v23, 0.0 }
  0xf8   :  { %v244_v26 = vpop.f32.mrf.mxu0  ;;  %643 = vmatmul.mubr.bf16.gmra.mxu1 %v419_v21 }
  0xf9   :  { %v245_v27 = vadd.f32 %v244_v26, %v1281_v11  ;;  %v369_v28 = vmax.f32 %v243_v24, 0.0 }
  0xfa   :  { %v248_v29 = vpop.f32.mrf.mxu0 }
  0xfb   :  { %v370_v31 = vmax.f32 %v245_v27, 0.0  ;;  %v421_v35 = vpack.c.bf16 %v369_v28, %v367_v32  ;;  %v249_v39 = vadd.f32 %v248_v29, %v1283_v12 }
  0xfc   :  { %v250_v33 = vpop.f32.mrf.mxu0 }
  0xfd   :  { %v422_v34 = vpack.c.bf16 %v370_v31, %v368_v30  ;;  %v251_v37 = vadd.f32 %v250_v33, %v1281_v11  ;;  %v371_v46 = vmax.f32 %v249_v39, 0.0 }
  0xfe   :  { %v252_v36 = vpop.f32.mrf.mxu0 }
  0xff   :  { %v253_v38 = vadd.f32 %v252_v36, %v1283_v12  ;;  %650 = vmatprep.mubr.bf16.mxu1 %v422_v34  ;;  %v372_v44 = vmax.f32 %v251_v37, 0.0 }
 0x100   :  { %v254_v40 = vpop.f32.mrf.mxu0  ;;  %651 = vmatmul.mubr.bf16.gmra.mxu1 %v421_v35 }
 0x101   :  { %v255_v41 = vadd.f32 %v254_v40, %v1281_v11  ;;  %v373_v42 = vmax.f32 %v253_v38, 0.0 }
 0x102   :  { %v258_v43 = vpop.f32.mrf.mxu0 }
 0x103   :  { %v374_v45 = vmax.f32 %v255_v41, 0.0  ;;  %v423_v49 = vpack.c.bf16 %v373_v42, %v371_v46  ;;  %v259_v53 = vadd.f32 %v258_v43, %v1283_v12 }
 0x104   :  { %v260_v47 = vpop.f32.mrf.mxu0 }
 0x105   :  { %v424_v48 = vpack.c.bf16 %v374_v45, %v372_v44  ;;  %v261_v51 = vadd.f32 %v260_v47, %v1281_v11  ;;  %v375_v60 = vmax.f32 %v259_v53, 0.0 }
 0x106   :  { %v262_v50 = vpop.f32.mrf.mxu0 }
 0x107   :  { %v263_v52 = vadd.f32 %v262_v50, %v1283_v12  ;;  %658 = vmatprep.mubr.bf16.mxu1 %v424_v48  ;;  %v376_v58 = vmax.f32 %v261_v51, 0.0 }
 0x108   :  { %v264_v54 = vpop.f32.mrf.mxu0  ;;  %659 = vmatmul.mubr.bf16.gmra.mxu1 %v423_v49 }
 0x109   :  { %v265_v55 = vadd.f32 %v264_v54, %v1281_v11  ;;  %v377_v56 = vmax.f32 %v263_v52, 0.0 }
 0x10a   :  { %v268_v57 = vpop.f32.mrf.mxu0 }
 0x10b   :  { %v378_v59 = vmax.f32 %v265_v55, 0.0  ;;  %v425_v63 = vpack.c.bf16 %v377_v56, %v375_v60  ;;  %v269_v4 = vadd.f32 %v268_v57, %v1283_v12 }
 0x10c   :  { %v270_v61 = vpop.f32.mrf.mxu0 }
 0x10d   :  { %v426_v62 = vpack.c.bf16 %v378_v59, %v376_v58  ;;  %v271_v2 = vadd.f32 %v270_v61, %v1281_v11  ;;  %v379_v1 = vmax.f32 %v269_v4, 0.0 }
 0x10e   :  { %v272_v0 = vpop.f32.mrf.mxu0 }
 0x10f   :  { %v273_v3 = vadd.f32 %v272_v0, %v1283_v12  ;;  %666 = vmatprep.mubr.bf16.mxu1 %v426_v62  ;;  %v380_v9 = vmax.f32 %v271_v2, 0.0 }
 0x110   :  { %v274_v5 = vpop.f32.mrf.mxu0  ;;  %667 = vmatmul.mubr.bf16.gmra.mxu1 %v425_v63 }
 0x111   :  { %v275_v6 = vadd.f32 %v274_v5, %v1281_v11  ;;  %v381_v7 = vmax.f32 %v273_v3, 0.0 }
 0x112   :  { %v278_v8 = vpop.f32.mrf.mxu0 }
 0x113   :  { %v382_v10 = vmax.f32 %v275_v6, 0.0  ;;  %v427_v15 = vpack.c.bf16 %v381_v7, %v379_v1  ;;  %v279_v19 = vadd.f32 %v278_v8, %v1283_v12 }
 0x114   :  { %v280_v13 = vpop.f32.mrf.mxu0 }
 0x115   :  { %v428_v14 = vpack.c.bf16 %v382_v10, %v380_v9  ;;  %v281_v17 = vadd.f32 %v280_v13, %v1281_v11  ;;  %v383_v26 = vmax.f32 %v279_v19, 0.0 }
 0x116   :  { %v282_v16 = vpop.f32.mrf.mxu0 }
 0x117   :  { %v283_v18 = vadd.f32 %v282_v16, %v1283_v12  ;;  %674 = vmatprep.mubr.bf16.mxu1 %v428_v14  ;;  %v384_v24 = vmax.f32 %v281_v17, 0.0 }
 0x118   :  { %v284_v20 = vpop.f32.mrf.mxu0  ;;  %675 = vmatmul.mubr.bf16.gmra.mxu1 %v427_v15 }
 0x119   :  { %v285_v21 = vadd.f32 %v284_v20, %v1281_v11  ;;  %v385_v22 = vmax.f32 %v283_v18, 0.0 }
 0x11a   :  { %v288_v23 = vpop.f32.mrf.mxu0 }
 0x11b   :  { %v386_v25 = vmax.f32 %v285_v21, 0.0  ;;  %v429_v29 = vpack.c.bf16 %v385_v22, %v383_v26  ;;  %v289_v33 = vadd.f32 %v288_v23, %v1283_v12 }
 0x11c   :  { %v290_v27 = vpop.f32.mrf.mxu0 }
 0x11d   :  { %v430_v28 = vpack.c.bf16 %v386_v25, %v384_v24  ;;  %v291_v31 = vadd.f32 %v290_v27, %v1281_v11  ;;  %v387_v40 = vmax.f32 %v289_v33, 0.0 }
 0x11e   :  { %v292_v30 = vpop.f32.mrf.mxu0 }
 0x11f   :  { %v293_v32 = vadd.f32 %v292_v30, %v1283_v12  ;;  %682 = vmatprep.mubr.bf16.mxu1 %v430_v28  ;;  %v388_v38 = vmax.f32 %v291_v31, 0.0 }
 0x120   :  { %v294_v34 = vpop.f32.mrf.mxu0  ;;  %683 = vmatmul.mubr.bf16.gmra.mxu1 %v429_v29 }
 0x121   :  { %v295_v35 = vadd.f32 %v294_v34, %v1281_v11  ;;  %v389_v36 = vmax.f32 %v293_v32, 0.0 }
 0x122   :  { %v298_v37 = vpop.f32.mrf.mxu0 }
 0x123   :  { %v390_v39 = vmax.f32 %v295_v35, 0.0  ;;  %v431_v43 = vpack.c.bf16 %v389_v36, %v387_v40  ;;  %v299_v47 = vadd.f32 %v298_v37, %v1283_v12 }
 0x124   :  { %v300_v41 = vpop.f32.mrf.mxu0 }
 0x125   :  { %v432_v42 = vpack.c.bf16 %v390_v39, %v388_v38  ;;  %v301_v45 = vadd.f32 %v300_v41, %v1281_v11  ;;  %v391_v54 = vmax.f32 %v299_v47, 0.0 }
 0x126   :  { %v302_v44 = vpop.f32.mrf.mxu0 }
 0x127   :  { %v303_v46 = vadd.f32 %v302_v44, %v1283_v12  ;;  %690 = vmatprep.mubr.bf16.mxu1 %v432_v42  ;;  %v392_v52 = vmax.f32 %v301_v45, 0.0 }
 0x128   :  { %v304_v48 = vpop.f32.mrf.mxu0  ;;  %691 = vmatmul.mubr.bf16.gmra.mxu1 %v431_v43 }
 0x129   :  { %v305_v49 = vadd.f32 %v304_v48, %v1281_v11  ;;  %v393_v50 = vmax.f32 %v303_v46, 0.0 }
 0x12a   :  { %v308_v51 = vpop.f32.mrf.mxu0 }
 0x12b   :  { %v394_v53 = vmax.f32 %v305_v49, 0.0  ;;  %v433_v57 = vpack.c.bf16 %v393_v50, %v391_v54  ;;  %v309_v61 = vadd.f32 %v308_v51, %v1283_v12  ;;  %v1352_v51 = vld [vmem:[%s1486_s4] ss:$0 sm:$0xff] }
 0x12c   :  { %v310_v55 = vpop.f32.mrf.mxu0 }
 0x12d   :  { %v434_v56 = vpack.c.bf16 %v394_v53, %v392_v52  ;;  %v311_v59 = vadd.f32 %v310_v55, %v1281_v11  ;;  %v395_v5 = vmax.f32 %v309_v61, 0.0 }
 0x12e   :  { %v312_v58 = vpop.f32.mrf.mxu0 }
 0x12f   :  { %v313_v60 = vadd.f32 %v312_v58, %v1283_v12  ;;  %698 = vmatprep.mubr.bf16.mxu1 %v434_v56  ;;  %v396_v3 = vmax.f32 %v311_v59, 0.0 }
 0x130   :  { %v314_v62 = vpop.f32.mrf.mxu0  ;;  %699 = vmatmul.mubr.bf16.gmra.mxu1 %v433_v57 }
 0x131   :  { %v315_v63 = vadd.f32 %v314_v62, %v1281_v11  ;;  %v397_v0 = vmax.f32 %v313_v60, 0.0 }
 0x132   :  { %v318_v2 = vpop.f32.mrf.mxu0 }
 0x133   :  { %v398_v4 = vmax.f32 %v315_v63, 0.0  ;;  %v435_v8 = vpack.c.bf16 %v397_v0, %v395_v5  ;;  %v319_v13 = vadd.f32 %v318_v2, %v1283_v12 }
 0x134   :  { %v320_v6 = vpop.f32.mrf.mxu0 }
 0x135   :  { %v436_v7 = vpack.c.bf16 %v398_v4, %v396_v3  ;;  %v321_v10 = vadd.f32 %v320_v6, %v1281_v11  ;;  %v399_v20 = vmax.f32 %v319_v13, 0.0 }
 0x136   :  { %v322_v9 = vpop.f32.mrf.mxu0 }
 0x137   :  { %v323_v1 = vadd.f32 %v322_v9, %v1283_v12  ;;  %706 = vmatprep.mubr.bf16.mxu1 %v436_v7  ;;  %v400_v18 = vmax.f32 %v321_v10, 0.0 }
 0x138   :  { %v324_v14 = vpop.f32.mrf.mxu0  ;;  %707 = vmatmul.mubr.bf16.gmra.mxu1 %v435_v8 }
 0x139   :  { %v325_v15 = vadd.f32 %v324_v14, %v1281_v11  ;;  %v401_v16 = vmax.f32 %v323_v1, 0.0 }
 0x13a   :  { %v328_v17 = vpop.f32.mrf.mxu0 }
 0x13b   :  { %v402_v19 = vmax.f32 %v325_v15, 0.0  ;;  %v437_v23 = vpack.c.bf16 %v401_v16, %v399_v20  ;;  %v329_v27 = vadd.f32 %v328_v17, %v1283_v12 }
 0x13c   :  { %v330_v21 = vpop.f32.mrf.mxu0 }
 0x13d   :  { %v438_v22 = vpack.c.bf16 %v402_v19, %v400_v18  ;;  %v331_v25 = vadd.f32 %v330_v21, %v1281_v11  ;;  %v403_v34 = vmax.f32 %v329_v27, 0.0 }
 0x13e   :  { %v332_v24 = vpop.f32.mrf.mxu0 }
 0x13f   :  { %v333_v26 = vadd.f32 %v332_v24, %v1283_v12  ;;  %714 = vmatprep.mubr.bf16.mxu1 %v438_v22  ;;  %v404_v32 = vmax.f32 %v331_v25, 0.0 }
 0x140   :  { %v334_v28 = vpop.f32.mrf.mxu0  ;;  %715 = vmatmul.mubr.bf16.gmra.mxu1 %v437_v23 }
 0x141   :  { %v335_v29 = vadd.f32 %v334_v28, %v1281_v11  ;;  %v405_v30 = vmax.f32 %v333_v26, 0.0 }
 0x142   :  { %v338_v31 = vpop.f32.mrf.mxu0 }
 0x143   :  { %v406_v33 = vmax.f32 %v335_v29, 0.0  ;;  %v439_v37 = vpack.c.bf16 %v405_v30, %v403_v34  ;;  %v339_v41 = vadd.f32 %v338_v31, %v1283_v12 }
 0x144   :  { %v340_v35 = vpop.f32.mrf.mxu0 }
 0x145   :  { %v440_v36 = vpack.c.bf16 %v406_v33, %v404_v32  ;;  %v341_v39 = vadd.f32 %v340_v35, %v1281_v11  ;;  %v407_v47 = vmax.f32 %v339_v41, 0.0 }
 0x146   :  { %v342_v38 = vpop.f32.mrf.mxu0 }
 0x147   :  { %v343_v40 = vadd.f32 %v342_v38, %v1283_v12  ;;  %722 = vmatprep.mubr.bf16.mxu1 %v440_v36  ;;  %v408_v45 = vmax.f32 %v341_v39, 0.0 }
 0x148   :  { %v344_v42 = vpop.f32.mrf.mxu0  ;;  %723 = vmatmul.mubr.bf16.gmra.mxu1 %v439_v37 }
 0x149   :  { %v345_v43 = vadd.f32 %v344_v42, %v1281_v11  ;;  %v409_v44 = vmax.f32 %v343_v40, 0.0 }
 0x14b   :  { %v410_v46 = vmax.f32 %v345_v43, 0.0  ;;  %v441_v49 = vpack.c.bf16 %v409_v44, %v407_v47 }
 0x14d   :  { %v442_v48 = vpack.c.bf16 %v410_v46, %v408_v45 }
 0x14f   :  { %730 = vmatprep.mubr.bf16.mxu1 %v442_v48 }
 0x150   :  { %731 = vmatmul.mubr.bf16.gmra.mxu1 %v441_v49 }
 0x198   :  { %v860_v50 = vpop.f32.mrf.mxu0 }
 0x19a   :  { %v861_v52 = vpop.f32.mrf.mxu0 }
 0x19b   :  { %v862_v12 = vadd.f32 %v861_v52, %v860_v50 }
 0x19c   :  { %v863_v53 = vpop.f32.mrf.mxu0 }
 0x19d   :  { %v613_v54 = vadd.f32 %v862_v12, %v1352_v51 }
 0x19e   :  { %v864_v11 = vpop.f32.mrf.mxu0 }
 0x19f   :  { %995 = vtanh.f32 %v613_v54  ;;  %v865_v55 = vadd.f32 %v864_v11, %v863_v53 }
 0x1a0   :  { %v866_v56 = vpop.f32.mrf.mxu1 }
 0x1a1   :  { %v616_v57 = vadd.f32 %v865_v55, %v1352_v51 }
 0x1a2   :  { %v867_v58 = vpop.f32.mrf.mxu1 }
 0x1a3   :  { %997 = vtanh.f32 %v616_v57  ;;  %v868_v59 = vadd.f32 %v867_v58, %v866_v56 }
 0x1a4   :  { %v869_v60 = vpop.f32.mrf.mxu1 }
 0x1a5   :  { %v621_v61 = vadd.f32 %v868_v59, %v1352_v51 }
 0x1a6   :  { %v870_v62 = vpop.f32.mrf.mxu1 }
 0x1a7   :  { %999 = vtanh.f32 %v621_v61  ;;  %v871_v63 = vadd.f32 %v870_v62, %v869_v60 }
 0x1a8   :  { %v872_v0 = vpop.f32.mrf.mxu1 }
 0x1a9   :  { %v624_v2 = vadd.f32 %v871_v63, %v1352_v51 }
 0x1aa   :  { %v873_v3 = vpop.f32.mrf.mxu1 }
 0x1ab   :  { %1001 = vtanh.f32 %v624_v2  ;;  %v874_v4 = vadd.f32 %v873_v3, %v872_v0 }
 0x1ac   :  { %v996_v5 = vpop.eup %995  ;;  %v875_v6 = vpop.f32.mrf.mxu1 }
 0x1ad   :  { %771 = vst [vmem:[%s1487_s5] sm:$0xff] %v996_v5  ;;  %v629_v7 = vadd.f32 %v874_v4, %v1352_v51 }
 0x1ae   :  { %v876_v8 = vpop.f32.mrf.mxu1 }
 0x1af   :  { %1003 = vtanh.f32 %v629_v7  ;;  %v877_v9 = vadd.f32 %v876_v8, %v875_v6 }
 0x1b0   :  { %v998_v10 = vpop.eup %997  ;;  %v878_v1 = vpop.f32.mrf.mxu1 }
 0x1b1   :  { %772 = vst [vmem:[%s1487_s5 + $0x8] sm:$0xff] %v998_v10  ;;  %v632_v13 = vadd.f32 %v877_v9, %v1352_v51 }
 0x1b2   :  { %v879_v14 = vpop.f32.mrf.mxu1 }
 0x1b3   :  { %1005 = vtanh.f32 %v632_v13  ;;  %v880_v15 = vadd.f32 %v879_v14, %v878_v1 }
 0x1b4   :  { %v1000_v16 = vpop.eup %999  ;;  %v881_v17 = vpop.f32.mrf.mxu1 }
 0x1b5   :  { %773 = vst [vmem:[%s1487_s5 + $0x10] sm:$0xff] %v1000_v16  ;;  %v637_v18 = vadd.f32 %v880_v15, %v1352_v51 }
 0x1b6   :  { %v882_v19 = vpop.f32.mrf.mxu1 }
 0x1b7   :  { %1007 = vtanh.f32 %v637_v18  ;;  %v883_v20 = vadd.f32 %v882_v19, %v881_v17 }
 0x1b8   :  { %v1002_v21 = vpop.eup %1001  ;;  %v884_v22 = vpop.f32.mrf.mxu1 }
 0x1b9   :  { %774 = vst [vmem:[%s1487_s5 + $0x18] sm:$0xff] %v1002_v21  ;;  %v640_v23 = vadd.f32 %v883_v20, %v1352_v51 }
 0x1ba   :  { %v885_v24 = vpop.f32.mrf.mxu1 }
 0x1bb   :  { %1009 = vtanh.f32 %v640_v23  ;;  %v886_v25 = vadd.f32 %v885_v24, %v884_v22 }
 0x1bc   :  { %v1004_v26 = vpop.eup %1003  ;;  %v887_v27 = vpop.f32.mrf.mxu1 }
 0x1bd   :  { %775 = vst [vmem:[%s1487_s5 + $0x20] sm:$0xff] %v1004_v26  ;;  %v645_v28 = vadd.f32 %v886_v25, %v1352_v51 }
 0x1be   :  { %v888_v29 = vpop.f32.mrf.mxu1 }
 0x1bf   :  { %1011 = vtanh.f32 %v645_v28  ;;  %v889_v30 = vadd.f32 %v888_v29, %v887_v27 }
 0x1c0   :  { %v1006_v31 = vpop.eup %1005  ;;  %v890_v32 = vpop.f32.mrf.mxu1 }
 0x1c1   :  { %776 = vst [vmem:[%s1487_s5 + $0x28] sm:$0xff] %v1006_v31  ;;  %v648_v33 = vadd.f32 %v889_v30, %v1352_v51 }
 0x1c2   :  { %v891_v34 = vpop.f32.mrf.mxu1 }
 0x1c3   :  { %1013 = vtanh.f32 %v648_v33  ;;  %v892_v35 = vadd.f32 %v891_v34, %v890_v32 }
 0x1c4   :  { %v1008_v36 = vpop.eup %1007  ;;  %v893_v37 = vpop.f32.mrf.mxu1 }
 0x1c5   :  { %777 = vst [vmem:[%s1487_s5 + $0x30] sm:$0xff] %v1008_v36  ;;  %v653_v38 = vadd.f32 %v892_v35, %v1352_v51 }
 0x1c6   :  { %v894_v39 = vpop.f32.mrf.mxu1 }
 0x1c7   :  { %1015 = vtanh.f32 %v653_v38  ;;  %v895_v40 = vadd.f32 %v894_v39, %v893_v37 }
 0x1c8   :  { %v1010_v41 = vpop.eup %1009  ;;  %v896_v42 = vpop.f32.mrf.mxu1 }
 0x1c9   :  { %778 = vst [vmem:[%s1487_s5 + $0x38] sm:$0xff] %v1010_v41  ;;  %v656_v43 = vadd.f32 %v895_v40, %v1352_v51 }
 0x1ca   :  { %v897_v44 = vpop.f32.mrf.mxu1 }
 0x1cb   :  { %1017 = vtanh.f32 %v656_v43  ;;  %v898_v45 = vadd.f32 %v897_v44, %v896_v42 }
 0x1cc   :  { %v1012_v46 = vpop.eup %1011  ;;  %v899_v47 = vpop.f32.mrf.mxu1 }
 0x1cd   :  { %779 = vst [vmem:[%s1487_s5 + $0x40] sm:$0xff] %v1012_v46  ;;  %v661_v48 = vadd.f32 %v898_v45, %v1352_v51 }
 0x1ce   :  { %v900_v49 = vpop.f32.mrf.mxu1 }
 0x1cf   :  { %1019 = vtanh.f32 %v661_v48  ;;  %v901_v50 = vadd.f32 %v900_v49, %v899_v47 }
 0x1d0   :  { %v1014_v52 = vpop.eup %1013  ;;  %v902_v12 = vpop.f32.mrf.mxu1 }
 0x1d1   :  { %780 = vst [vmem:[%s1487_s5 + $0x48] sm:$0xff] %v1014_v52  ;;  %v664_v53 = vadd.f32 %v901_v50, %v1352_v51 }
 0x1d2   :  { %v903_v54 = vpop.f32.mrf.mxu1 }
 0x1d3   :  { %1021 = vtanh.f32 %v664_v53  ;;  %v904_v11 = vadd.f32 %v903_v54, %v902_v12 }
 0x1d4   :  { %v1016_v55 = vpop.eup %1015  ;;  %v905_v56 = vpop.f32.mrf.mxu1 }
 0x1d5   :  { %781 = vst [vmem:[%s1487_s5 + $0x50] sm:$0xff] %v1016_v55  ;;  %v669_v57 = vadd.f32 %v904_v11, %v1352_v51 }
 0x1d6   :  { %v906_v58 = vpop.f32.mrf.mxu1 }
 0x1d7   :  { %1023 = vtanh.f32 %v669_v57  ;;  %v907_v59 = vadd.f32 %v906_v58, %v905_v56 }
 0x1d8   :  { %v1018_v60 = vpop.eup %1017  ;;  %v908_v61 = vpop.f32.mrf.mxu1 }
 0x1d9   :  { %782 = vst [vmem:[%s1487_s5 + $0x58] sm:$0xff] %v1018_v60  ;;  %v672_v62 = vadd.f32 %v907_v59, %v1352_v51 }
 0x1da   :  { %v909_v63 = vpop.f32.mrf.mxu1 }
 0x1db   :  { %1025 = vtanh.f32 %v672_v62  ;;  %v910_v0 = vadd.f32 %v909_v63, %v908_v61 }
 0x1dc   :  { %v1020_v2 = vpop.eup %1019  ;;  %v911_v3 = vpop.f32.mrf.mxu1 }
 0x1dd   :  { %783 = vst [vmem:[%s1487_s5 + $0x60] sm:$0xff] %v1020_v2  ;;  %v677_v4 = vadd.f32 %v910_v0, %v1352_v51 }
 0x1de   :  { %v912_v5 = vpop.f32.mrf.mxu1 }
 0x1df   :  { %1027 = vtanh.f32 %v677_v4  ;;  %v913_v6 = vadd.f32 %v912_v5, %v911_v3 }
 0x1e0   :  { %v1022_v7 = vpop.eup %1021  ;;  %v914_v8 = vpop.f32.mrf.mxu1 }
 0x1e1   :  { %784 = vst [vmem:[%s1487_s5 + $0x68] sm:$0xff] %v1022_v7  ;;  %v680_v9 = vadd.f32 %v913_v6, %v1352_v51 }
 0x1e2   :  { %v915_v10 = vpop.f32.mrf.mxu1 }
 0x1e3   :  { %1029 = vtanh.f32 %v680_v9  ;;  %v916_v1 = vadd.f32 %v915_v10, %v914_v8 }
 0x1e4   :  { %v1024_v13 = vpop.eup %1023  ;;  %v917_v14 = vpop.f32.mrf.mxu1 }
 0x1e5   :  { %785 = vst [vmem:[%s1487_s5 + $0x70] sm:$0xff] %v1024_v13  ;;  %v685_v15 = vadd.f32 %v916_v1, %v1352_v51 }
 0x1e6   :  { %v918_v16 = vpop.f32.mrf.mxu1 }
 0x1e7   :  { %1031 = vtanh.f32 %v685_v15  ;;  %v919_v17 = vadd.f32 %v918_v16, %v917_v14 }
 0x1e8   :  { %v1026_v18 = vpop.eup %1025  ;;  %v920_v19 = vpop.f32.mrf.mxu1 }
 0x1e9   :  { %786 = vst [vmem:[%s1487_s5 + $0x78] sm:$0xff] %v1026_v18  ;;  %v688_v20 = vadd.f32 %v919_v17, %v1352_v51 }
 0x1ea   :  { %v921_v21 = vpop.f32.mrf.mxu1 }
 0x1eb   :  { %1033 = vtanh.f32 %v688_v20  ;;  %v922_v22 = vadd.f32 %v921_v21, %v920_v19 }
 0x1ec   :  { %v1028_v23 = vpop.eup %1027  ;;  %v923_v24 = vpop.f32.mrf.mxu1 }
 0x1ed   :  { %787 = vst [vmem:[%s1487_s5 + $0x80] sm:$0xff] %v1028_v23  ;;  %v693_v25 = vadd.f32 %v922_v22, %v1352_v51 }
 0x1ee   :  { %v924_v26 = vpop.f32.mrf.mxu1 }
 0x1ef   :  { %1035 = vtanh.f32 %v693_v25  ;;  %v925_v27 = vadd.f32 %v924_v26, %v923_v24 }
 0x1f0   :  { %v1030_v28 = vpop.eup %1029  ;;  %v926_v29 = vpop.f32.mrf.mxu1 }
 0x1f1   :  { %788 = vst [vmem:[%s1487_s5 + $0x88] sm:$0xff] %v1030_v28  ;;  %v696_v30 = vadd.f32 %v925_v27, %v1352_v51 }
 0x1f2   :  { %v927_v31 = vpop.f32.mrf.mxu1 }
 0x1f3   :  { %1037 = vtanh.f32 %v696_v30  ;;  %v928_v32 = vadd.f32 %v927_v31, %v926_v29 }
 0x1f4   :  { %v1032_v33 = vpop.eup %1031  ;;  %v929_v34 = vpop.f32.mrf.mxu1 }
 0x1f5   :  { %789 = vst [vmem:[%s1487_s5 + $0x90] sm:$0xff] %v1032_v33  ;;  %v701_v35 = vadd.f32 %v928_v32, %v1352_v51 }
 0x1f6   :  { %v930_v36 = vpop.f32.mrf.mxu1 }
 0x1f7   :  { %1039 = vtanh.f32 %v701_v35  ;;  %v931_v37 = vadd.f32 %v930_v36, %v929_v34 }
 0x1f8   :  { %v1034_v38 = vpop.eup %1033  ;;  %v932_v39 = vpop.f32.mrf.mxu1 }
 0x1f9   :  { %790 = vst [vmem:[%s1487_s5 + $0x98] sm:$0xff] %v1034_v38  ;;  %v704_v40 = vadd.f32 %v931_v37, %v1352_v51 }
 0x1fa   :  { %v933_v41 = vpop.f32.mrf.mxu1 }
 0x1fb   :  { %1041 = vtanh.f32 %v704_v40  ;;  %v934_v42 = vadd.f32 %v933_v41, %v932_v39 }
 0x1fc   :  { %v1036_v43 = vpop.eup %1035  ;;  %v935_v44 = vpop.f32.mrf.mxu1 }
 0x1fd   :  { %791 = vst [vmem:[%s1487_s5 + $0xa0] sm:$0xff] %v1036_v43  ;;  %v709_v45 = vadd.f32 %v934_v42, %v1352_v51 }
 0x1fe   :  { %v936_v46 = vpop.f32.mrf.mxu1 }
 0x1ff   :  { %1043 = vtanh.f32 %v709_v45  ;;  %v937_v47 = vadd.f32 %v936_v46, %v935_v44 }
 0x200   :  { %v1038_v48 = vpop.eup %1037  ;;  %v938_v49 = vpop.f32.mrf.mxu1 }
 0x201   :  { %792 = vst [vmem:[%s1487_s5 + $0xa8] sm:$0xff] %v1038_v48  ;;  %v712_v50 = vadd.f32 %v937_v47, %v1352_v51 }
 0x202   :  { %v939_v52 = vpop.f32.mrf.mxu1 }
 0x203   :  { %1045 = vtanh.f32 %v712_v50  ;;  %v940_v12 = vadd.f32 %v939_v52, %v938_v49 }
 0x204   :  { %v1040_v53 = vpop.eup %1039  ;;  %v941_v54 = vpop.f32.mrf.mxu1 }
 0x205   :  { %793 = vst [vmem:[%s1487_s5 + $0xb0] sm:$0xff] %v1040_v53  ;;  %v717_v11 = vadd.f32 %v940_v12, %v1352_v51 }
 0x206   :  { %v942_v55 = vpop.f32.mrf.mxu1 }
 0x207   :  { %1047 = vtanh.f32 %v717_v11  ;;  %v943_v56 = vadd.f32 %v942_v55, %v941_v54 }
 0x208   :  { %v1042_v57 = vpop.eup %1041  ;;  %v944_v58 = vpop.f32.mrf.mxu1 }
 0x209   :  { %794 = vst [vmem:[%s1487_s5 + $0xb8] sm:$0xff] %v1042_v57  ;;  %v720_v59 = vadd.f32 %v943_v56, %v1352_v51 }
 0x20a   :  { %v945_v60 = vpop.f32.mrf.mxu1 }
 0x20b   :  { %1049 = vtanh.f32 %v720_v59  ;;  %v946_v61 = vadd.f32 %v945_v60, %v944_v58 }
 0x20c   :  { %v1044_v62 = vpop.eup %1043  ;;  %v947_v63 = vpop.f32.mrf.mxu1 }
 0x20d   :  { %795 = vst [vmem:[%s1487_s5 + $0xc0] sm:$0xff] %v1044_v62  ;;  %v725_v0 = vadd.f32 %v946_v61, %v1352_v51 }
 0x20e   :  { %v948_v2 = vpop.f32.mrf.mxu1 }
 0x20f   :  { %1051 = vtanh.f32 %v725_v0  ;;  %v949_v3 = vadd.f32 %v948_v2, %v947_v63 }
 0x210   :  { %v1046_v4 = vpop.eup %1045  ;;  %v950_v5 = vpop.f32.mrf.mxu1 }
 0x211   :  { %796 = vst [vmem:[%s1487_s5 + $0xc8] sm:$0xff] %v1046_v4  ;;  %v728_v6 = vadd.f32 %v949_v3, %v1352_v51 }
 0x212   :  { %v951_v7 = vpop.f32.mrf.mxu1 }
 0x213   :  { %1053 = vtanh.f32 %v728_v6  ;;  %v952_v8 = vadd.f32 %v951_v7, %v950_v5 }
 0x214   :  { %v1048_v9 = vpop.eup %1047  ;;  %v953_v10 = vpop.f32.mrf.mxu1 }
 0x215   :  { %797 = vst [vmem:[%s1487_s5 + $0xd0] sm:$0xff] %v1048_v9  ;;  %v733_v1 = vadd.f32 %v952_v8, %v1352_v51 }
 0x216   :  { %v954_v13 = vpop.f32.mrf.mxu1 }
 0x217   :  { %1055 = vtanh.f32 %v733_v1  ;;  %v955_v14 = vadd.f32 %v954_v13, %v953_v10 }
 0x218   :  { %v1050_v15 = vpop.eup %1049 }
 0x219   :  { %798 = vst [vmem:[%s1487_s5 + $0xd8] sm:$0xff] %v1050_v15  ;;  %v736_v16 = vadd.f32 %v955_v14, %v1352_v51 }
 0x21b   :  { %1057 = vtanh.f32 %v736_v16 }
 0x21c   :  { %v1052_v17 = vpop.eup %1051 }
 0x21d   :  { %799 = vst [vmem:[%s1487_s5 + $0xe0] sm:$0xff] %v1052_v17 }
 0x220   :  { %v1054_v18 = vpop.eup %1053 }
 0x221   :  { %800 = vst [vmem:[%s1487_s5 + $0xe8] sm:$0xff] %v1054_v18 }
 0x224   :  { %v1056_v19 = vpop.eup %1055 }
 0x225   :  { %801 = vst [vmem:[%s1487_s5 + $0xf0] sm:$0xff] %v1056_v19 }
 0x228   :  { %v1058_v20 = vpop.eup %1057 }
 0x229   :  { %802 = vst [vmem:[%s1487_s5 + $0xf8] sm:$0xff] %v1058_v20 }

</bundles_post_ra>
